<compile_context>
chip_gen: v7x
topology: tpu7x:2x2x1
jax: 0.10.0
libtpu: 0.0.40
codegen_flags: <defaults>
</compile_context>

<pallas_src>
import functools

import jax
import jax.numpy as jnp
import numpy as np
from jax.experimental import pallas as pl
from jax.experimental.pallas import tpu as pltpu


def _round_up(x, m):
    return ((x + m - 1) // m) * m


def _birnn_kernel(win_ref, wcat_ref, whf_ref, whb_ref, out_ref, proj_ref,
                  *, T, K, O, Hd, dim):
    """Bidirectional ReLU-RNN over a block of windows.

    win_ref  : (N_blk, T*dim)    window-flattened inputs (lane-concat over time)
    wcat_ref : (dim, 2*Hd)       fused input->hidden weights [W_ih_f^T | W_ih_b^T]
    whf_ref  : (Hd, Hd)          forward  hidden->hidden weight (transposed)
    whb_ref  : (Hd, Hd)          backward hidden->hidden weight (transposed)
    out_ref  : (N_blk, K*2*Hd)   halo-trimmed output, final layout
                                 (inner pos k -> lanes [k*2Hd, (k+1)*2Hd))
    proj_ref : (T, N_blk, 2*Hd)  f32 VMEM scratch for hoisted input projections
    """
    n_blk = win_ref.shape[0]

    # ---- Phase 1: hoisted input projections (independent MXU matmuls) -----
    wcat = wcat_ref[...]
    for t in range(T):
        xt = win_ref[:, t * dim:(t + 1) * dim]              # (N_blk, dim)
        proj_ref[t] = jnp.dot(xt, wcat, preferred_element_type=jnp.float32)

    # ---- Phase 2: serial recurrence (only h @ W_hh left on the chain) -----
    whf = whf_ref[...]                                      # load once
    whb = whb_ref[...]
    cdt = whf.dtype                                         # MXU input dtype

    hf = jnp.zeros((n_blk, Hd), jnp.float32)
    hb = jnp.zeros((n_blk, Hd), jnp.float32)
    # T = kernel_size + 2*overlap is small by construction -> static unroll.
    # (For larger T, switch to lax.fori_loop(..., unroll=True) carrying hf/hb.)
    for t in range(T):
        tb = T - 1 - t
        # forward direction, position t
        hf = jnp.maximum(
            proj_ref[t, :, :Hd]
            + jnp.dot(hf.astype(cdt), whf, preferred_element_type=jnp.float32),
            0.0)
        # backward direction, position T-1-t (independent chain -> overlaps)
        hb = jnp.maximum(
            proj_ref[tb, :, Hd:]
            + jnp.dot(hb.astype(cdt), whb, preferred_element_type=jnp.float32),
            0.0)
        # store only the non-halo positions, directly in the final layout
        if O <= t < T - O:
            k = t - O
            out_ref[:, k * 2 * Hd: k * 2 * Hd + Hd] = hf.astype(out_ref.dtype)
        if O <= tb < T - O:
            kb = tb - O
            out_ref[:, kb * 2 * Hd + Hd: (kb + 1) * 2 * Hd] = hb.astype(out_ref.dtype)


def short_seq_lstm_forward(query, params, *, kernel_size, overlap,
                           compute_dtype=jnp.bfloat16, n_block=512):
    """Forward pass of ShortSeqLSTM (stride=1, key=value=None)."""
    bs, seqlen, dim = query.shape
    K, O = kernel_size, overlap
    T = K + 2 * O
    Hd = params["w_ih_f"].shape[0]                 # all_head_size // 2
    assert 2 * Hd == dim, "all_head_size must equal hidden_size"

    L = seqlen // K + 1                            # number of unfold patches
    N = bs * L

    # --- glue: build window-flattened input (N, T*dim), no transposes. ------
    # Replicates F.pad(query, (0,0,0,K,0,0)) + Unfold([T,1], pad=[O,0], stride=[K,1]).
    # TODO(synk): gather the K+2*O halo inside the kernel (pl.ANY + manual DMA)
    # to avoid the ~T/K x HBM duplication of the materialized unfold.
    padded = jnp.pad(query, ((0, 0), (O, K + O), (0, 0)))
    idx = jnp.arange(L)[:, None] * K + jnp.arange(T)[None, :]        # (L, T)
    win = padded[:, idx, :].reshape(N, T * dim).astype(compute_dtype)

    # --- pick N block size (multiple of 8, minimal padding waste) -----------
    num_blocks = pl.cdiv(N, n_block)
    n_blk = _round_up(pl.cdiv(N, num_blocks), 8)
    n_pad = n_blk * num_blocks
    if n_pad != N:
        win = jnp.pad(win, ((0, n_pad - N), (0, 0)))

    # --- weights: fuse the two input projections, pre-transpose for x @ W ---
    wcat = jnp.concatenate([params["w_ih_f"].T, params["w_ih_b"].T],
                           axis=1).astype(compute_dtype)             # (dim, 2Hd)
    whf = params["w_hh_f"].T.astype(compute_dtype)                   # (Hd, Hd)
    whb = params["w_hh_b"].T.astype(compute_dtype)

    out_dtype = query.dtype
    kernel = functools.partial(_birnn_kernel, T=T, K=K, O=O, Hd=Hd, dim=dim)

    out_flat = pl.pallas_call(
        kernel,
        out_shape=jax.ShapeDtypeStruct((n_pad, K * 2 * Hd), out_dtype),
        grid_spec=pltpu.PrefetchScalarGridSpec(
            num_scalar_prefetch=0,
            grid=(n_pad // n_blk,),
            in_specs=[
                pl.BlockSpec((n_blk, T * dim), lambda n: (n, 0)),    # windows
                pl.BlockSpec((dim, 2 * Hd), lambda n: (0, 0)),       # W_ih fused
                pl.BlockSpec((Hd, Hd), lambda n: (0, 0)),            # W_hh fwd
                pl.BlockSpec((Hd, Hd), lambda n: (0, 0)),            # W_hh bwd
            ],
            out_specs=pl.BlockSpec((n_blk, K * 2 * Hd), lambda n: (n, 0)),
            scratch_shapes=[pltpu.VMEM((T, n_blk, 2 * Hd), jnp.float32)],
        ),
        compiler_params=pltpu.CompilerParams(
            dimension_semantics=("parallel",)),
    )(win, wcat, whf, whb)

    # --- epilogue: pure reshape + slice (output already in final layout) ----
    out = out_flat[:N].reshape(bs, L * K, 2 * Hd)[:, :seqlen]
    return out


def _reference(query, params, *, kernel_size, overlap):
    """Pure-JAX f32 reference of the same forward pass (lax.scan RNN)."""
    bs, seqlen, dim = query.shape
    K, O = kernel_size, overlap
    T = K + 2 * O
    L = seqlen // K + 1
    Hd = params["w_ih_f"].shape[0]

    padded = jnp.pad(query, ((0, 0), (O, K + O), (0, 0)))
    idx = jnp.arange(L)[:, None] * K + jnp.arange(T)[None, :]
    win = padded[:, idx, :].reshape(bs * L, T, dim).astype(jnp.float32)

    def rnn(x, wih, whh):  # x: (N, T, dim)
        def step(h, xt):
            h = jax.nn.relu(xt @ wih.T + h @ whh.T)
            return h, h
        h0 = jnp.zeros((x.shape[0], Hd), jnp.float32)
        _, hs = jax.lax.scan(step, h0, jnp.swapaxes(x, 0, 1))
        return jnp.swapaxes(hs, 0, 1)

    fwd = rnn(win, params["w_ih_f"], params["w_hh_f"])
    bwd = rnn(win[:, ::-1, :], params["w_ih_b"], params["w_hh_b"])[:, ::-1, :]
    out = jnp.concatenate([fwd, bwd], axis=-1)
    out = out.reshape(bs, L, T, 2 * Hd)[:, :, O:T - O, :]
    return out.reshape(bs, L * K, 2 * Hd)[:, :seqlen]


if __name__ == "__main__":
    # Small shapes consistent with the module.
    bs, seqlen = 2, 8
    hidden_size = 32
    heads, head_size = 4, 8          # all_head_size = 32 == hidden_size
    kernel_size, overlap = 4, 2
    all_head_size = heads * head_size
    Hd = all_head_size // 2          # per-direction RNN hidden size

    key = jax.random.PRNGKey(0)
    kq, k1, k2, k3, k4 = jax.random.split(key, 5)
    query = jax.random.normal(kq, (bs, seqlen, hidden_size), dtype=jnp.float32)

    # Deterministic init mimicking nn.RNN default U(-1/sqrt(H), 1/sqrt(H)), no bias.
    bound = 1.0 / (Hd ** 0.5)
    params = {
        "w_ih_f": jax.random.uniform(k1, (Hd, hidden_size), jnp.float32, -bound, bound),
        "w_hh_f": jax.random.uniform(k2, (Hd, Hd), jnp.float32, -bound, bound),
        "w_ih_b": jax.random.uniform(k3, (Hd, hidden_size), jnp.float32, -bound, bound),
        "w_hh_b": jax.random.uniform(k4, (Hd, Hd), jnp.float32, -bound, bound),
    }

    ref = _reference(query, params, kernel_size=kernel_size, overlap=overlap)

    # f32 compute path: tight check against the scan reference.
    fwd_f32 = functools.partial(short_seq_lstm_forward, kernel_size=kernel_size,
                                overlap=overlap, compute_dtype=jnp.float32)
    out_f32 = jax.block_until_ready(jax.jit(fwd_f32)(query, params))
    assert out_f32.shape == (bs, seqlen, hidden_size), out_f32.shape
    np.testing.assert_allclose(np.asarray(out_f32), np.asarray(ref),
                               rtol=1e-4, atol=1e-4)

    # bf16 compute path (production default: MXU-native inputs, f32 accumulate).
    fwd_bf16 = functools.partial(short_seq_lstm_forward, kernel_size=kernel_size,
                                 overlap=overlap, compute_dtype=jnp.bfloat16)
    out_bf16 = jax.block_until_ready(jax.jit(fwd_bf16)(query, params))
    assert out_bf16.shape == (bs, seqlen, hidden_size), out_bf16.shape
    np.testing.assert_allclose(np.asarray(out_bf16), np.asarray(ref),
                               rtol=5e-2, atol=5e-2)

    # TODO(synk): upsample/pool_tensor branches (seqlen < context_len or stride > 1)
    # are not exercised here; they are plain resampling glue outside the hot path.
    print("KERNEL_OK")
</pallas_src>

<mosaic_0001>
module attributes {stable_mosaic.version = 11 : i64} {
  func.func @_birnn_kernel(%arg0: i32, %arg1: memref<8x256xf32, #tpu.memory_space<vmem>>, %arg2: memref<32x32xf32, #tpu.memory_space<vmem>>, %arg3: memref<16x16xf32, #tpu.memory_space<vmem>>, %arg4: memref<16x16xf32, #tpu.memory_space<vmem>>, %arg5: memref<8x128xf32, #tpu.memory_space<vmem>>, %arg6: memref<8x8x32xf32, #tpu.memory_space<vmem>>) attributes {dimension_semantics = [#tpu.dimension_semantics<parallel>], iteration_bounds = array<i64: 1>, scalar_prefetch = 0 : i64, scratch_operands = 1 : i64, tpu.core_type = #tpu.core_type<tc>, window_params = [{transform_indices = @transform_0, window_bounds = array<i64: 8, 256>}, {pipeline_mode = #tpu.pipeline_mode<synchronous>, transform_indices = @transform_1, window_bounds = array<i64: 32, 32>}, {pipeline_mode = #tpu.pipeline_mode<synchronous>, transform_indices = @transform_2, window_bounds = array<i64: 16, 16>}, {pipeline_mode = #tpu.pipeline_mode<synchronous>, transform_indices = @transform_3, window_bounds = array<i64: 16, 16>}, {transform_indices = @transform_4, window_bounds = array<i64: 8, 128>}]} {
    %c0 = arith.constant 0 : index
    %c0_0 = arith.constant 0 : index
    %0 = vector.load %arg2[%c0, %c0_0] : memref<32x32xf32, #tpu.memory_space<vmem>>, vector<32x32xf32>
    %c0_1 = arith.constant 0 : index
    %c0_2 = arith.constant 0 : index
    %1 = vector.load %arg1[%c0_1, %c0_2] : memref<8x256xf32, #tpu.memory_space<vmem>>, vector<8x32xf32>
    %cst = arith.constant dense<0.000000e+00> : vector<8x32xf32>
    %2 = tpu.matmul %1, %0, %cst {dimension_numbers = #tpu.dot_dimension_numbers<[1], [0], [0], [1], [0, 0, 1, 1], [], []>} : vector<8x32xf32>, vector<32x32xf32>, vector<8x32xf32> -> vector<8x32xf32>
    %c0_3 = arith.constant 0 : index
    %c0_4 = arith.constant 0 : index
    %c0_5 = arith.constant 0 : index
    %3 = vector.load %arg6[%c0_3, %c0_4, %c0_5] : memref<8x8x32xf32, #tpu.memory_space<vmem>>, vector<1x8x32xf32>
    %4 = vector.shape_cast %3 : vector<1x8x32xf32> to vector<8x32xf32>
    %5 = vector.shape_cast %2 : vector<8x32xf32> to vector<1x8x32xf32>
    tpu.vector_store %arg6[%c0_3, %c0_4, %c0_5], %5 {strides = array<i32>} : memref<8x8x32xf32, #tpu.memory_space<vmem>>, vector<1x8x32xf32>,
    %c0_6 = arith.constant 0 : index
    %c32 = arith.constant 32 : index
    %6 = vector.load %arg1[%c0_6, %c32] : memref<8x256xf32, #tpu.memory_space<vmem>>, vector<8x32xf32>
    %cst_7 = arith.constant dense<0.000000e+00> : vector<8x32xf32>
    %7 = tpu.matmul %6, %0, %cst_7 {dimension_numbers = #tpu.dot_dimension_numbers<[1], [0], [0], [1], [0, 0, 1, 1], [], []>} : vector<8x32xf32>, vector<32x32xf32>, vector<8x32xf32> -> vector<8x32xf32>
    %c1 = arith.constant 1 : index
    %c0_8 = arith.constant 0 : index
    %c0_9 = arith.constant 0 : index
    %8 = vector.load %arg6[%c1, %c0_8, %c0_9] : memref<8x8x32xf32, #tpu.memory_space<vmem>>, vector<1x8x32xf32>
    %9 = vector.shape_cast %8 : vector<1x8x32xf32> to vector<8x32xf32>
    %10 = vector.shape_cast %7 : vector<8x32xf32> to vector<1x8x32xf32>
    tpu.vector_store %arg6[%c1, %c0_8, %c0_9], %10 {strides = array<i32>} : memref<8x8x32xf32, #tpu.memory_space<vmem>>, vector<1x8x32xf32>,
    %c0_10 = arith.constant 0 : index
    %c64 = arith.constant 64 : index
    %11 = vector.load %arg1[%c0_10, %c64] : memref<8x256xf32, #tpu.memory_space<vmem>>, vector<8x32xf32>
    %cst_11 = arith.constant dense<0.000000e+00> : vector<8x32xf32>
    %12 = tpu.matmul %11, %0, %cst_11 {dimension_numbers = #tpu.dot_dimension_numbers<[1], [0], [0], [1], [0, 0, 1, 1], [], []>} : vector<8x32xf32>, vector<32x32xf32>, vector<8x32xf32> -> vector<8x32xf32>
    %c2 = arith.constant 2 : index
    %c0_12 = arith.constant 0 : index
    %c0_13 = arith.constant 0 : index
    %13 = vector.load %arg6[%c2, %c0_12, %c0_13] : memref<8x8x32xf32, #tpu.memory_space<vmem>>, vector<1x8x32xf32>
    %14 = vector.shape_cast %13 : vector<1x8x32xf32> to vector<8x32xf32>
    %15 = vector.shape_cast %12 : vector<8x32xf32> to vector<1x8x32xf32>
    tpu.vector_store %arg6[%c2, %c0_12, %c0_13], %15 {strides = array<i32>} : memref<8x8x32xf32, #tpu.memory_space<vmem>>, vector<1x8x32xf32>,
    %c0_14 = arith.constant 0 : index
    %c96 = arith.constant 96 : index
    %16 = vector.load %arg1[%c0_14, %c96] : memref<8x256xf32, #tpu.memory_space<vmem>>, vector<8x32xf32>
    %cst_15 = arith.constant dense<0.000000e+00> : vector<8x32xf32>
    %17 = tpu.matmul %16, %0, %cst_15 {dimension_numbers = #tpu.dot_dimension_numbers<[1], [0], [0], [1], [0, 0, 1, 1], [], []>} : vector<8x32xf32>, vector<32x32xf32>, vector<8x32xf32> -> vector<8x32xf32>
    %c3 = arith.constant 3 : index
    %c0_16 = arith.constant 0 : index
    %c0_17 = arith.constant 0 : index
    %18 = vector.load %arg6[%c3, %c0_16, %c0_17] : memref<8x8x32xf32, #tpu.memory_space<vmem>>, vector<1x8x32xf32>
    %19 = vector.shape_cast %18 : vector<1x8x32xf32> to vector<8x32xf32>
    %20 = vector.shape_cast %17 : vector<8x32xf32> to vector<1x8x32xf32>
    tpu.vector_store %arg6[%c3, %c0_16, %c0_17], %20 {strides = array<i32>} : memref<8x8x32xf32, #tpu.memory_space<vmem>>, vector<1x8x32xf32>,
    %c0_18 = arith.constant 0 : index
    %c128 = arith.constant 128 : index
    %21 = vector.load %arg1[%c0_18, %c128] : memref<8x256xf32, #tpu.memory_space<vmem>>, vector<8x32xf32>
    %cst_19 = arith.constant dense<0.000000e+00> : vector<8x32xf32>
    %22 = tpu.matmul %21, %0, %cst_19 {dimension_numbers = #tpu.dot_dimension_numbers<[1], [0], [0], [1], [0, 0, 1, 1], [], []>} : vector<8x32xf32>, vector<32x32xf32>, vector<8x32xf32> -> vector<8x32xf32>
    %c4 = arith.constant 4 : index
    %c0_20 = arith.constant 0 : index
    %c0_21 = arith.constant 0 : index
    %23 = vector.load %arg6[%c4, %c0_20, %c0_21] : memref<8x8x32xf32, #tpu.memory_space<vmem>>, vector<1x8x32xf32>
    %24 = vector.shape_cast %23 : vector<1x8x32xf32> to vector<8x32xf32>
    %25 = vector.shape_cast %22 : vector<8x32xf32> to vector<1x8x32xf32>
    tpu.vector_store %arg6[%c4, %c0_20, %c0_21], %25 {strides = array<i32>} : memref<8x8x32xf32, #tpu.memory_space<vmem>>, vector<1x8x32xf32>,
    %c0_22 = arith.constant 0 : index
    %c160 = arith.constant 160 : index
    %26 = vector.load %arg1[%c0_22, %c160] : memref<8x256xf32, #tpu.memory_space<vmem>>, vector<8x32xf32>
    %cst_23 = arith.constant dense<0.000000e+00> : vector<8x32xf32>
    %27 = tpu.matmul %26, %0, %cst_23 {dimension_numbers = #tpu.dot_dimension_numbers<[1], [0], [0], [1], [0, 0, 1, 1], [], []>} : vector<8x32xf32>, vector<32x32xf32>, vector<8x32xf32> -> vector<8x32xf32>
    %c5 = arith.constant 5 : index
    %c0_24 = arith.constant 0 : index
    %c0_25 = arith.constant 0 : index
    %28 = vector.load %arg6[%c5, %c0_24, %c0_25] : memref<8x8x32xf32, #tpu.memory_space<vmem>>, vector<1x8x32xf32>
    %29 = vector.shape_cast %28 : vector<1x8x32xf32> to vector<8x32xf32>
    %30 = vector.shape_cast %27 : vector<8x32xf32> to vector<1x8x32xf32>
    tpu.vector_store %arg6[%c5, %c0_24, %c0_25], %30 {strides = array<i32>} : memref<8x8x32xf32, #tpu.memory_space<vmem>>, vector<1x8x32xf32>,
    %c0_26 = arith.constant 0 : index
    %c192 = arith.constant 192 : index
    %31 = vector.load %arg1[%c0_26, %c192] : memref<8x256xf32, #tpu.memory_space<vmem>>, vector<8x32xf32>
    %cst_27 = arith.constant dense<0.000000e+00> : vector<8x32xf32>
    %32 = tpu.matmul %31, %0, %cst_27 {dimension_numbers = #tpu.dot_dimension_numbers<[1], [0], [0], [1], [0, 0, 1, 1], [], []>} : vector<8x32xf32>, vector<32x32xf32>, vector<8x32xf32> -> vector<8x32xf32>
    %c6 = arith.constant 6 : index
    %c0_28 = arith.constant 0 : index
    %c0_29 = arith.constant 0 : index
    %33 = vector.load %arg6[%c6, %c0_28, %c0_29] : memref<8x8x32xf32, #tpu.memory_space<vmem>>, vector<1x8x32xf32>
    %34 = vector.shape_cast %33 : vector<1x8x32xf32> to vector<8x32xf32>
    %35 = vector.shape_cast %32 : vector<8x32xf32> to vector<1x8x32xf32>
    tpu.vector_store %arg6[%c6, %c0_28, %c0_29], %35 {strides = array<i32>} : memref<8x8x32xf32, #tpu.memory_space<vmem>>, vector<1x8x32xf32>,
    %c0_30 = arith.constant 0 : index
    %c224 = arith.constant 224 : index
    %36 = vector.load %arg1[%c0_30, %c224] : memref<8x256xf32, #tpu.memory_space<vmem>>, vector<8x32xf32>
    %cst_31 = arith.constant dense<0.000000e+00> : vector<8x32xf32>
    %37 = tpu.matmul %36, %0, %cst_31 {dimension_numbers = #tpu.dot_dimension_numbers<[1], [0], [0], [1], [0, 0, 1, 1], [], []>} : vector<8x32xf32>, vector<32x32xf32>, vector<8x32xf32> -> vector<8x32xf32>
    %c7 = arith.constant 7 : index
    %c0_32 = arith.constant 0 : index
    %c0_33 = arith.constant 0 : index
    %38 = vector.load %arg6[%c7, %c0_32, %c0_33] : memref<8x8x32xf32, #tpu.memory_space<vmem>>, vector<1x8x32xf32>
    %39 = vector.shape_cast %38 : vector<1x8x32xf32> to vector<8x32xf32>
    %40 = vector.shape_cast %37 : vector<8x32xf32> to vector<1x8x32xf32>
    tpu.vector_store %arg6[%c7, %c0_32, %c0_33], %40 {strides = array<i32>} : memref<8x8x32xf32, #tpu.memory_space<vmem>>, vector<1x8x32xf32>,
    %c0_34 = arith.constant 0 : index
    %c0_35 = arith.constant 0 : index
    %41 = vector.load %arg3[%c0_34, %c0_35] : memref<16x16xf32, #tpu.memory_space<vmem>>, vector<16x16xf32>
    %c0_36 = arith.constant 0 : index
    %c0_37 = arith.constant 0 : index
    %42 = vector.load %arg4[%c0_36, %c0_37] : memref<16x16xf32, #tpu.memory_space<vmem>>, vector<16x16xf32>
    %cst_38 = arith.constant 0.000000e+00 : f32
    %43 = vector.broadcast %cst_38 : f32 to vector<8x16xf32>
    %cst_39 = arith.constant 0.000000e+00 : f32
    %44 = vector.broadcast %cst_39 : f32 to vector<8x16xf32>
    %c0_40 = arith.constant 0 : index
    %c0_41 = arith.constant 0 : index
    %c0_42 = arith.constant 0 : index
    %45 = vector.load %arg6[%c0_40, %c0_41, %c0_42] : memref<8x8x32xf32, #tpu.memory_space<vmem>>, vector<1x8x16xf32>
    %46 = vector.shape_cast %45 : vector<1x8x16xf32> to vector<8x16xf32>
    %cst_43 = arith.constant dense<0.000000e+00> : vector<8x16xf32>
    %47 = tpu.matmul %43, %41, %cst_43 {dimension_numbers = #tpu.dot_dimension_numbers<[1], [0], [0], [1], [0, 0, 1, 1], [], []>} : vector<8x16xf32>, vector<16x16xf32>, vector<8x16xf32> -> vector<8x16xf32>
    %48 = arith.addf %46, %47 : vector<8x16xf32>
    %cst_44 = arith.constant 0.000000e+00 : f32
    %49 = vector.broadcast %cst_44 : f32 to vector<8x16xf32>
    %50 = arith.maximumf %48, %49 : vector<8x16xf32>
    %c7_45 = arith.constant 7 : index
    %c0_46 = arith.constant 0 : index
    %c16 = arith.constant 16 : index
    %51 = vector.load %arg6[%c7_45, %c0_46, %c16] : memref<8x8x32xf32, #tpu.memory_space<vmem>>, vector<1x8x16xf32>
    %52 = vector.shape_cast %51 : vector<1x8x16xf32> to vector<8x16xf32>
    %cst_47 = arith.constant dense<0.000000e+00> : vector<8x16xf32>
    %53 = tpu.matmul %44, %42, %cst_47 {dimension_numbers = #tpu.dot_dimension_numbers<[1], [0], [0], [1], [0, 0, 1, 1], [], []>} : vector<8x16xf32>, vector<16x16xf32>, vector<8x16xf32> -> vector<8x16xf32>
    %54 = arith.addf %52, %53 : vector<8x16xf32>
    %cst_48 = arith.constant 0.000000e+00 : f32
    %55 = vector.broadcast %cst_48 : f32 to vector<8x16xf32>
    %56 = arith.maximumf %54, %55 : vector<8x16xf32>
    %c1_49 = arith.constant 1 : index
    %c0_50 = arith.constant 0 : index
    %c0_51 = arith.constant 0 : index
    %57 = vector.load %arg6[%c1_49, %c0_50, %c0_51] : memref<8x8x32xf32, #tpu.memory_space<vmem>>, vector<1x8x16xf32>
    %58 = vector.shape_cast %57 : vector<1x8x16xf32> to vector<8x16xf32>
    %cst_52 = arith.constant dense<0.000000e+00> : vector<8x16xf32>
    %59 = tpu.matmul %50, %41, %cst_52 {dimension_numbers = #tpu.dot_dimension_numbers<[1], [0], [0], [1], [0, 0, 1, 1], [], []>} : vector<8x16xf32>, vector<16x16xf32>, vector<8x16xf32> -> vector<8x16xf32>
    %60 = arith.addf %58, %59 : vector<8x16xf32>
    %cst_53 = arith.constant 0.000000e+00 : f32
    %61 = vector.broadcast %cst_53 : f32 to vector<8x16xf32>
    %62 = arith.maximumf %60, %61 : vector<8x16xf32>
    %c6_54 = arith.constant 6 : index
    %c0_55 = arith.constant 0 : index
    %c16_56 = arith.constant 16 : index
    %63 = vector.load %arg6[%c6_54, %c0_55, %c16_56] : memref<8x8x32xf32, #tpu.memory_space<vmem>>, vector<1x8x16xf32>
    %64 = vector.shape_cast %63 : vector<1x8x16xf32> to vector<8x16xf32>
    %cst_57 = arith.constant dense<0.000000e+00> : vector<8x16xf32>
    %65 = tpu.matmul %56, %42, %cst_57 {dimension_numbers = #tpu.dot_dimension_numbers<[1], [0], [0], [1], [0, 0, 1, 1], [], []>} : vector<8x16xf32>, vector<16x16xf32>, vector<8x16xf32> -> vector<8x16xf32>
    %66 = arith.addf %64, %65 : vector<8x16xf32>
    %cst_58 = arith.constant 0.000000e+00 : f32
    %67 = vector.broadcast %cst_58 : f32 to vector<8x16xf32>
    %68 = arith.maximumf %66, %67 : vector<8x16xf32>
    %c2_59 = arith.constant 2 : index
    %c0_60 = arith.constant 0 : index
    %c0_61 = arith.constant 0 : index
    %69 = vector.load %arg6[%c2_59, %c0_60, %c0_61] : memref<8x8x32xf32, #tpu.memory_space<vmem>>, vector<1x8x16xf32>
    %70 = vector.shape_cast %69 : vector<1x8x16xf32> to vector<8x16xf32>
    %cst_62 = arith.constant dense<0.000000e+00> : vector<8x16xf32>
    %71 = tpu.matmul %62, %41, %cst_62 {dimension_numbers = #tpu.dot_dimension_numbers<[1], [0], [0], [1], [0, 0, 1, 1], [], []>} : vector<8x16xf32>, vector<16x16xf32>, vector<8x16xf32> -> vector<8x16xf32>
    %72 = arith.addf %70, %71 : vector<8x16xf32>
    %cst_63 = arith.constant 0.000000e+00 : f32
    %73 = vector.broadcast %cst_63 : f32 to vector<8x16xf32>
    %74 = arith.maximumf %72, %73 : vector<8x16xf32>
    %c5_64 = arith.constant 5 : index
    %c0_65 = arith.constant 0 : index
    %c16_66 = arith.constant 16 : index
    %75 = vector.load %arg6[%c5_64, %c0_65, %c16_66] : memref<8x8x32xf32, #tpu.memory_space<vmem>>, vector<1x8x16xf32>
    %76 = vector.shape_cast %75 : vector<1x8x16xf32> to vector<8x16xf32>
    %cst_67 = arith.constant dense<0.000000e+00> : vector<8x16xf32>
    %77 = tpu.matmul %68, %42, %cst_67 {dimension_numbers = #tpu.dot_dimension_numbers<[1], [0], [0], [1], [0, 0, 1, 1], [], []>} : vector<8x16xf32>, vector<16x16xf32>, vector<8x16xf32> -> vector<8x16xf32>
    %78 = arith.addf %76, %77 : vector<8x16xf32>
    %cst_68 = arith.constant 0.000000e+00 : f32
    %79 = vector.broadcast %cst_68 : f32 to vector<8x16xf32>
    %80 = arith.maximumf %78, %79 : vector<8x16xf32>
    %c0_69 = arith.constant 0 : index
    %c0_70 = arith.constant 0 : index
    %81 = vector.load %arg5[%c0_69, %c0_70] : memref<8x128xf32, #tpu.memory_space<vmem>>, vector<8x16xf32>
    tpu.vector_store %arg5[%c0_69, %c0_70], %74 {strides = array<i32>} : memref<8x128xf32, #tpu.memory_space<vmem>>, vector<8x16xf32>,
    %c0_71 = arith.constant 0 : index
    %c112 = arith.constant 112 : index
    %82 = vector.load %arg5[%c0_71, %c112] : memref<8x128xf32, #tpu.memory_space<vmem>>, vector<8x16xf32>
    tpu.vector_store %arg5[%c0_71, %c112], %80 {strides = array<i32>} : memref<8x128xf32, #tpu.memory_space<vmem>>, vector<8x16xf32>,
    %c3_72 = arith.constant 3 : index
    %c0_73 = arith.constant 0 : index
    %c0_74 = arith.constant 0 : index
    %83 = vector.load %arg6[%c3_72, %c0_73, %c0_74] : memref<8x8x32xf32, #tpu.memory_space<vmem>>, vector<1x8x16xf32>
    %84 = vector.shape_cast %83 : vector<1x8x16xf32> to vector<8x16xf32>
    %cst_75 = arith.constant dense<0.000000e+00> : vector<8x16xf32>
    %85 = tpu.matmul %74, %41, %cst_75 {dimension_numbers = #tpu.dot_dimension_numbers<[1], [0], [0], [1], [0, 0, 1, 1], [], []>} : vector<8x16xf32>, vector<16x16xf32>, vector<8x16xf32> -> vector<8x16xf32>
    %86 = arith.addf %84, %85 : vector<8x16xf32>
    %cst_76 = arith.constant 0.000000e+00 : f32
    %87 = vector.broadcast %cst_76 : f32 to vector<8x16xf32>
    %88 = arith.maximumf %86, %87 : vector<8x16xf32>
    %c4_77 = arith.constant 4 : index
    %c0_78 = arith.constant 0 : index
    %c16_79 = arith.constant 16 : index
    %89 = vector.load %arg6[%c4_77, %c0_78, %c16_79] : memref<8x8x32xf32, #tpu.memory_space<vmem>>, vector<1x8x16xf32>
    %90 = vector.shape_cast %89 : vector<1x8x16xf32> to vector<8x16xf32>
    %cst_80 = arith.constant dense<0.000000e+00> : vector<8x16xf32>
    %91 = tpu.matmul %80, %42, %cst_80 {dimension_numbers = #tpu.dot_dimension_numbers<[1], [0], [0], [1], [0, 0, 1, 1], [], []>} : vector<8x16xf32>, vector<16x16xf32>, vector<8x16xf32> -> vector<8x16xf32>
    %92 = arith.addf %90, %91 : vector<8x16xf32>
    %cst_81 = arith.constant 0.000000e+00 : f32
    %93 = vector.broadcast %cst_81 : f32 to vector<8x16xf32>
    %94 = arith.maximumf %92, %93 : vector<8x16xf32>
    %c0_82 = arith.constant 0 : index
    %c32_83 = arith.constant 32 : index
    %95 = vector.load %arg5[%c0_82, %c32_83] : memref<8x128xf32, #tpu.memory_space<vmem>>, vector<8x16xf32>
    tpu.vector_store %arg5[%c0_82, %c32_83], %88 {strides = array<i32>} : memref<8x128xf32, #tpu.memory_space<vmem>>, vector<8x16xf32>,
    %c0_84 = arith.constant 0 : index
    %c80 = arith.constant 80 : index
    %96 = vector.load %arg5[%c0_84, %c80] : memref<8x128xf32, #tpu.memory_space<vmem>>, vector<8x16xf32>
    tpu.vector_store %arg5[%c0_84, %c80], %94 {strides = array<i32>} : memref<8x128xf32, #tpu.memory_space<vmem>>, vector<8x16xf32>,
    %c4_85 = arith.constant 4 : index
    %c0_86 = arith.constant 0 : index
    %c0_87 = arith.constant 0 : index
    %97 = vector.load %arg6[%c4_85, %c0_86, %c0_87] : memref<8x8x32xf32, #tpu.memory_space<vmem>>, vector<1x8x16xf32>
    %98 = vector.shape_cast %97 : vector<1x8x16xf32> to vector<8x16xf32>
    %cst_88 = arith.constant dense<0.000000e+00> : vector<8x16xf32>
    %99 = tpu.matmul %88, %41, %cst_88 {dimension_numbers = #tpu.dot_dimension_numbers<[1], [0], [0], [1], [0, 0, 1, 1], [], []>} : vector<8x16xf32>, vector<16x16xf32>, vector<8x16xf32> -> vector<8x16xf32>
    %100 = arith.addf %98, %99 : vector<8x16xf32>
    %cst_89 = arith.constant 0.000000e+00 : f32
    %101 = vector.broadcast %cst_89 : f32 to vector<8x16xf32>
    %102 = arith.maximumf %100, %101 : vector<8x16xf32>
    %c3_90 = arith.constant 3 : index
    %c0_91 = arith.constant 0 : index
    %c16_92 = arith.constant 16 : index
    %103 = vector.load %arg6[%c3_90, %c0_91, %c16_92] : memref<8x8x32xf32, #tpu.memory_space<vmem>>, vector<1x8x16xf32>
    %104 = vector.shape_cast %103 : vector<1x8x16xf32> to vector<8x16xf32>
    %cst_93 = arith.constant dense<0.000000e+00> : vector<8x16xf32>
    %105 = tpu.matmul %94, %42, %cst_93 {dimension_numbers = #tpu.dot_dimension_numbers<[1], [0], [0], [1], [0, 0, 1, 1], [], []>} : vector<8x16xf32>, vector<16x16xf32>, vector<8x16xf32> -> vector<8x16xf32>
    %106 = arith.addf %104, %105 : vector<8x16xf32>
    %cst_94 = arith.constant 0.000000e+00 : f32
    %107 = vector.broadcast %cst_94 : f32 to vector<8x16xf32>
    %108 = arith.maximumf %106, %107 : vector<8x16xf32>
    %c0_95 = arith.constant 0 : index
    %c64_96 = arith.constant 64 : index
    %109 = vector.load %arg5[%c0_95, %c64_96] : memref<8x128xf32, #tpu.memory_space<vmem>>, vector<8x16xf32>
    tpu.vector_store %arg5[%c0_95, %c64_96], %102 {strides = array<i32>} : memref<8x128xf32, #tpu.memory_space<vmem>>, vector<8x16xf32>,
    %c0_97 = arith.constant 0 : index
    %c48 = arith.constant 48 : index
    %110 = vector.load %arg5[%c0_97, %c48] : memref<8x128xf32, #tpu.memory_space<vmem>>, vector<8x16xf32>
    tpu.vector_store %arg5[%c0_97, %c48], %108 {strides = array<i32>} : memref<8x128xf32, #tpu.memory_space<vmem>>, vector<8x16xf32>,
    %c5_98 = arith.constant 5 : index
    %c0_99 = arith.constant 0 : index
    %c0_100 = arith.constant 0 : index
    %111 = vector.load %arg6[%c5_98, %c0_99, %c0_100] : memref<8x8x32xf32, #tpu.memory_space<vmem>>, vector<1x8x16xf32>
    %112 = vector.shape_cast %111 : vector<1x8x16xf32> to vector<8x16xf32>
    %cst_101 = arith.constant dense<0.000000e+00> : vector<8x16xf32>
    %113 = tpu.matmul %102, %41, %cst_101 {dimension_numbers = #tpu.dot_dimension_numbers<[1], [0], [0], [1], [0, 0, 1, 1], [], []>} : vector<8x16xf32>, vector<16x16xf32>, vector<8x16xf32> -> vector<8x16xf32>
    %114 = arith.addf %112, %113 : vector<8x16xf32>
    %cst_102 = arith.constant 0.000000e+00 : f32
    %115 = vector.broadcast %cst_102 : f32 to vector<8x16xf32>
    %116 = arith.maximumf %114, %115 : vector<8x16xf32>
    %c2_103 = arith.constant 2 : index
    %c0_104 = arith.constant 0 : index
    %c16_105 = arith.constant 16 : index
    %117 = vector.load %arg6[%c2_103, %c0_104, %c16_105] : memref<8x8x32xf32, #tpu.memory_space<vmem>>, vector<1x8x16xf32>
    %118 = vector.shape_cast %117 : vector<1x8x16xf32> to vector<8x16xf32>
    %cst_106 = arith.constant dense<0.000000e+00> : vector<8x16xf32>
    %119 = tpu.matmul %108, %42, %cst_106 {dimension_numbers = #tpu.dot_dimension_numbers<[1], [0], [0], [1], [0, 0, 1, 1], [], []>} : vector<8x16xf32>, vector<16x16xf32>, vector<8x16xf32> -> vector<8x16xf32>
    %120 = arith.addf %118, %119 : vector<8x16xf32>
    %cst_107 = arith.constant 0.000000e+00 : f32
    %121 = vector.broadcast %cst_107 : f32 to vector<8x16xf32>
    %122 = arith.maximumf %120, %121 : vector<8x16xf32>
    %c0_108 = arith.constant 0 : index
    %c96_109 = arith.constant 96 : index
    %123 = vector.load %arg5[%c0_108, %c96_109] : memref<8x128xf32, #tpu.memory_space<vmem>>, vector<8x16xf32>
    tpu.vector_store %arg5[%c0_108, %c96_109], %116 {strides = array<i32>} : memref<8x128xf32, #tpu.memory_space<vmem>>, vector<8x16xf32>,
    %c0_110 = arith.constant 0 : index
    %c16_111 = arith.constant 16 : index
    %124 = vector.load %arg5[%c0_110, %c16_111] : memref<8x128xf32, #tpu.memory_space<vmem>>, vector<8x16xf32>
    tpu.vector_store %arg5[%c0_110, %c16_111], %122 {strides = array<i32>} : memref<8x128xf32, #tpu.memory_space<vmem>>, vector<8x16xf32>,
    return
  }
  func.func @transform_0(%arg0: i32) -> (i32, i32) {
    %c0_i32 = arith.constant 0 : i32
    %c0_i32_0 = arith.constant 0 : i32
    return %arg0, %c0_i32 : i32, i32
  }
  func.func @transform_1(%arg0: i32) -> (i32, i32) {
    %c0_i32 = arith.constant 0 : i32
    %c0_i32_0 = arith.constant 0 : i32
    %c0_i32_1 = arith.constant 0 : i32
    return %c0_i32, %c0_i32_0 : i32, i32
  }
  func.func @transform_2(%arg0: i32) -> (i32, i32) {
    %c0_i32 = arith.constant 0 : i32
    %c0_i32_0 = arith.constant 0 : i32
    %c0_i32_1 = arith.constant 0 : i32
    return %c0_i32, %c0_i32_0 : i32, i32
  }
  func.func @transform_3(%arg0: i32) -> (i32, i32) {
    %c0_i32 = arith.constant 0 : i32
    %c0_i32_0 = arith.constant 0 : i32
    %c0_i32_1 = arith.constant 0 : i32
    return %c0_i32, %c0_i32_0 : i32, i32
  }
  func.func @transform_4(%arg0: i32) -> (i32, i32) {
    %c0_i32 = arith.constant 0 : i32
    %c0_i32_0 = arith.constant 0 : i32
    return %arg0, %c0_i32 : i32, i32
  }
}

</mosaic_0001>

<bundles_post_ra>
// kernel: short_seq_lstm_forward.1
= control target key start
LH: loop header
LB: loop body
LE: loop exit
PB: predicated region body
PF: predicated region fallthrough
CT: control target
= control target key end

     0   :  { %v1985_v2 = vmov 0.0|0.0   ;;  %vm1986_vm0 = vmmov 0   ;;  %v1987_v4 = vmov 0.0   ;;  %s1988_s21 = smov 96   ;;  %s1989_s27 = smov 32   ;;  %vm22_vm1 = vcmask 261120   ;;  %s2244_s0 = inlined_call_operand.vmem [shape: f32[8,256], index: 0, kind: input, shape index: {}]   ;;  %s2245_s1 = inlined_call_operand.vmem [shape: f32[32,32], index: 1, kind: input, shape index: {}]   ;;  %s2246_s3 = inlined_call_operand.vmem [shape: f32[16,16], index: 3, kind: input, shape index: {}]   ;;  %s2247_s2 = inlined_call_operand.vmem [shape: f32[16,16], index: 2, kind: input, shape index: {}]   ;;  %s2248_s4 = inlined_call_operand.vmem [shape: f32[8,128], index: 4, kind: output, shape index: {}]  }
   0x1   :  { %v2021_v0 = vld [vmem:[%s2244_s0] sm:$0xff]  ;;  %v2026_v1 = vld [vmem:[%s2244_s0 + $0x8] sm:$0xff]  ;;  %1899 = vmatprep.subr.bf16.mxu1 %v1985_v2  ;;  %1740 = vmatprep.mubr.msk.f32.mxu1 %vm1986_vm0, %v1987_v4  ;;  %v19_v6 = vld [vmem:[%s2245_s1 + $0x10] sm:$0xff]  ;;  %s1991_s5 = smov 64   ;;  %s1992_s6 = smov 112   ;;  %vm646_vm2 = vcmask 130048  }
   0x2   :  { %v17_v3 = vld [vmem:[%s2245_s1] sm:$0xff]  ;;  %99 = vrot.lane.b32.xlu0 %v2021_v0, %s1988_s21  ;;  %409 = vrot.lane.b32.xlu1 %v2026_v1, %s1988_s21  ;;  %v18_v5 = vld [vmem:[%s2245_s1 + $0x8] sm:$0xff]  ;;  %vm1120_vm3 = vcmask 1048448   ;;  %vm1283_vm4 = vcmask 392448   ;;  %vm1289_vm5 = vcmask 786048   ;;  %vm1451_vm6 = vcmask 654848  }
   0x3   :  { %v2044_v7 = vpack.c.bf16 %v18_v5, %v17_v3  ;;  %v20_v8 = vld [vmem:[%s2245_s1 + $0x18] sm:$0xff]  ;;  %1893 = vmatprep.subr.bf16.mxu0 %v1985_v2  ;;  %1729 = vmatprep.mubr.msk.f32.mxu0 %vm1986_vm0, %v1987_v4  ;;  %v643_v13 = vld [vmem:[%s2246_s3] sm:$0xff]  ;;  %v644_v14 = vld [vmem:[%s2246_s3 + $0x8] sm:$0xff]  ;;  %s1990_s3 = smov 16   ;;  %vm1457_vm7 = vcmask 523648   ;;  %vm1619_vm8 = vcmask 917248  }
   0x4   :  { %v2053_v9 = vpack.c.bf16 %v20_v8, %v19_v6  ;;  %v2100_v16 = vpack.c.bf16 %v644_v14, %v643_v13  ;;  %v641_v34 = vld [vmem:[%s2247_s2] sm:$0xff]  ;;  %v642_v35 = vld [vmem:[%s2247_s2 + $0x8] sm:$0xff]  ;;  %vm1621_vm9 = vcmask 261248  }
   0x5   :  { %1901 = vmatpush3.bf16.msra.mxu1 %v2044_v7  ;;  %1895 = vmatpush3.bf16.msra.mxu0 %v2044_v7  ;;  %v2146_v37 = vpack.c.bf16 %v642_v35, %v641_v34 }
   0x6   :  { %255 = vrot.lane.b32.xlu0 %v2021_v0, %s1989_s27  ;;  %565 = vrot.lane.b32.xlu1 %v2026_v1, %s1989_s27 }
   0x7   :  { %1902 = vmatprep.subr.bf16.mxu1 %v1985_v2  ;;  %1896 = vmatprep.subr.bf16.mxu0 %v1985_v2 }
   0x9   :  { %1904 = vmatpush3.bf16.msra.mxu1 %v2053_v9  ;;  %1898 = vmatpush3.bf16.msra.mxu0 %v2053_v9 }
   0xa   :  { %1911 = vmatprep.subr.bf16.mxu1 %v1985_v2  ;;  %1905 = vmatprep.subr.bf16.mxu0 %v1985_v2 }
   0xc   :  { %1730 = vmatmul.mubr.msk.f32.vlgmr.msra.gmra.mrb[0].mxu0 %vm22_vm1, %v2021_v0 }
   0xd   :  { %1907 = vmatpush3.bf16.msra.mxu0 %v2044_v7  ;;  %1751 = vmatprep.mubr.msk.f32.mxu0 %vm1986_vm0, %v1987_v4 }
   0xe   :  { %1908 = vmatprep.subr.bf16.mxu0 %v1985_v2 }
  0x11   :  { %1910 = vmatpush3.bf16.msra.mxu0 %v2053_v9 }
  0x12   :  { %1917 = vmatprep.subr.bf16.mxu0 %v1985_v2 }
  0x74   :  { %v100_v10 = vpop.permute.xlu0 %99  ;;  %v410_v12 = vpop.permute.xlu1 %409 }
  0x75   :  { %1741 = vmatmul.mubr.msk.f32.vlgmr.msra.gmra.mrb[0].mxu1 %vm22_vm1, %v100_v10 }
  0x76   :  { %1913 = vmatpush3.bf16.msra.mxu1 %v2044_v7  ;;  %1762 = vmatprep.mubr.msk.f32.mxu1 %vm1986_vm0, %v1987_v4 }
  0x77   :  { %1914 = vmatprep.subr.bf16.mxu1 %v1985_v2 }
  0x78   :  { %v256_v11 = vpop.permute.xlu0 %255  ;;  %v566_v15 = vpop.permute.xlu1 %565 }
  0x7a   :  { %1916 = vmatpush3.bf16.msra.mxu1 %v2053_v9 }
  0x7b   :  { %1923 = vmatprep.subr.bf16.mxu1 %v1985_v2 }
  0x7d   :  { %1763 = vmatmul.mubr.msk.f32.vlgmr.msra.gmra.mrb[2].mxu1 %vm22_vm1, %v256_v11 }
  0x7e   :  { %1925 = vmatpush3.bf16.msra.mxu1 %v2044_v7  ;;  %1784 = vmatprep.mubr.msk.f32.mxu1 %vm1986_vm0, %v1987_v4 }
  0x7f   :  { %1926 = vmatprep.subr.bf16.mxu1 %v1985_v2 }
  0x82   :  { %1928 = vmatpush3.bf16.msra.mxu1 %v2053_v9 }
  0x83   :  { %1935 = vmatprep.subr.bf16.mxu1 %v1985_v2 }
  0x85   :  { %1785 = vmatmul.mubr.msk.f32.vlgmr.msra.gmra.mrb[4].mxu1 %vm22_vm1, %v410_v12 }
  0x86   :  { %1937 = vmatpush3.bf16.msra.mxu1 %v2044_v7  ;;  %1806 = vmatprep.mubr.msk.f32.mxu1 %vm1986_vm0, %v1987_v4 }
  0x87   :  { %1938 = vmatprep.subr.bf16.mxu1 %v1985_v2 }
  0x8a   :  { %1940 = vmatpush3.bf16.msra.mxu1 %v2053_v9 }
  0x8b   :  { %1944 = vmatprep.subr.bf16.mxu1 %v1985_v2 }
  0x8d   :  { %1807 = vmatmul.mubr.msk.f32.vlgmr.msra.gmra.mrb[6].mxu1 %vm22_vm1, %v566_v15 }
  0x8e   :  { %1946 = vmatpush3.bf16.msra.mxu1 %v2100_v16  ;;  %1820 = vmatprep.mubr.msk.f32.mxu1 %vm1986_vm0, %v1987_v4 }
  0x8f   :  { %1950 = vmatprep.subr.bf16.mxu1 %v1985_v2 }
  0x91   :  { %1821 = vmatmul.mubr.f32.vlgmr.msra.gmra.mrb[8].mxu1 %v1987_v4 }
  0x92   :  { %1952 = vmatpush3.bf16.msra.mxu1 %v2100_v16  ;;  %1834 = vmatprep.mubr.msk.f32.mxu1 %vm1986_vm0, %v1987_v4 }
  0x93   :  { %1956 = vmatprep.subr.bf16.mxu1 %v1985_v2 }
  0xdf   :  { %v92_v29 = vpop.f32.mrb[0].mxu0 }
  0xe0   :  { %96 = vst.msk [vmem:[#allocation2] sm:$0xff] %vm22_vm1, %v92_v29  ;;  %v1731_v31 = vpop.f32.mrb[1].mxu0 }
  0xe7   :  { %v645_v47 = vld [vmem:[#allocation2] sm:$0xff] }
 0x148   :  { %v169_v17 = vpop.f32.mrb[0].mxu1 }
 0x149   :  { %174 = vst.msk [vmem:[#allocation2 + $0x8] sm:$0xff] %vm22_vm1, %v169_v17  ;;  %v1742_v18 = vpop.f32.mrb[1].mxu1 }
 0x150   :  { %v325_v19 = vpop.f32.mrb[2].mxu1  ;;  %v799_v56 = vld [vmem:[#allocation2 + $0x8] sm:$0xff] }
 0x151   :  { %330 = vst.msk [vmem:[#allocation2 + $0x18] sm:$0xff] %vm22_vm1, %v325_v19  ;;  %v1764_v20 = vpop.f32.mrb[3].mxu1 }
 0x158   :  { %v479_v21 = vpop.f32.mrb[4].mxu1  ;;  %v1122_v11 = vld [vmem:[#allocation2 + $0x18] sm:$0xff] }
 0x159   :  { %484 = vst.msk [vmem:[#allocation2 + $0x28] sm:$0xff] %vm22_vm1, %v479_v21  ;;  %v1786_v22 = vpop.f32.mrb[5].mxu1 }
 0x160   :  { %v635_v23 = vpop.f32.mrb[6].mxu1 }
 0x161   :  { %640 = vst.msk [vmem:[#allocation2 + $0x38] sm:$0xff] %vm22_vm1, %v635_v23  ;;  %v1808_v24 = vpop.f32.mrb[7].mxu1 }
 0x164   :  { %v789_v25 = vpop.f32.mrb[8].mxu1 }
 0x165   :  { %794 = vrot.lane.b32.xlu0 %v789_v25, %s1990_s3  ;;  %v1822_v26 = vpop.f32.mrb[9].mxu1 }
 0x168   :  { %v722_v27 = vld [vmem:[#allocation2 + $0x38] sm:$0xff] }
 0x169   :  { %177 = vrot.lane.b32.xlu0 %v2021_v0, %s1991_s5 }
 0x1d7   :  { %v795_v28 = vpop.permute.xlu0 %794 }
 0x1d8   :  { %v797_v30 = vadd.f32 %v795_v28, %v722_v27 }
 0x1da   :  { %v798_v32 = vmax.f32 %v797_v30, 0.0 }
 0x1db   :  { %v178_v33 = vpop.permute.xlu0 %177 }
 0x1dc   :  { %877 = vrot.lane.b32.xlu1 %v798_v32, %s1992_s6  ;;  %1752 = vmatmul.mubr.msk.f32.vlgmr.msra.gmra.mrb[2].mxu0 %vm22_vm1, %v178_v33 }
 0x1dd   :  { %1919 = vmatpush3.bf16.msra.mxu0 %v2044_v7  ;;  %1773 = vmatprep.mubr.msk.f32.mxu0 %vm1986_vm0, %v1987_v4 }
 0x1de   :  { %1920 = vmatprep.subr.bf16.mxu0 %v1985_v2 }
 0x1e0   :  { %487 = vrot.lane.b32.xlu1 %v2026_v1, %s1991_s5 }
 0x1e1   :  { %1922 = vmatpush3.bf16.msra.mxu0 %v2053_v9 }
 0x1e2   :  { %1929 = vmatprep.subr.bf16.mxu0 %v1985_v2 }
 0x1e4   :  { %1774 = vmatmul.mubr.msk.f32.vlgmr.msra.gmra.mrb[4].mxu0 %vm22_vm1, %v2026_v1 }
 0x1e5   :  { %1931 = vmatpush3.bf16.msra.mxu0 %v2044_v7  ;;  %1795 = vmatprep.mubr.msk.f32.mxu0 %vm1986_vm0, %v1987_v4  ;;  %v1033_v7 = vld [vmem:[#allocation2 + $0x28] sm:$0xff] }
 0x1e6   :  { %1932 = vmatprep.subr.bf16.mxu0 %v1985_v2 }
 0x1e9   :  { %1934 = vmatpush3.bf16.msra.mxu0 %v2053_v9 }
 0x1ea   :  { %1941 = vmatprep.subr.bf16.mxu0 %v1985_v2 }
 0x24e   :  { %v878_v36 = vpop.permute.xlu1 %877 }
 0x24f   :  { %1835 = vmatmul.mubr.msk.f32.vlgmr.msra.gmra.mrb[10].mxu1 %vm646_vm2, %v878_v36 }
 0x250   :  { %1958 = vmatpush3.bf16.msra.mxu1 %v2100_v16  ;;  %1848 = vmatprep.mubr.msk.f32.mxu1 %vm1986_vm0, %v1987_v4 }
 0x251   :  { %1962 = vmatprep.subr.bf16.mxu1 %v1985_v2 }
 0x252   :  { %v488_v38 = vpop.permute.xlu1 %487 }
 0x253   :  { %1796 = vmatmul.mubr.msk.f32.vlgmr.msra.gmra.mrb[6].mxu0 %vm22_vm1, %v488_v38 }
 0x254   :  { %1943 = vmatpush3.bf16.msra.mxu0 %v2146_v37  ;;  %1813 = vmatprep.mubr.msk.f32.mxu0 %vm1986_vm0, %v1987_v4 }
 0x255   :  { %1947 = vmatprep.subr.bf16.mxu0 %v1985_v2 }
 0x257   :  { %1814 = vmatmul.mubr.f32.vlgmr.msra.gmra.mrb[8].mxu0 %v1987_v4 }
 0x258   :  { %1949 = vmatpush3.bf16.msra.mxu0 %v2146_v37  ;;  %1827 = vmatprep.mubr.msk.f32.mxu0 %vm1986_vm0, %v1987_v4 }
 0x259   :  { %1953 = vmatprep.subr.bf16.mxu0 %v1985_v2 }
 0x2af   :  { %v247_v39 = vpop.f32.mrb[2].mxu0 }
 0x2b0   :  { %252 = vst.msk [vmem:[#allocation2 + $0x10] sm:$0xff] %vm22_vm1, %v247_v39  ;;  %v1753_v40 = vpop.f32.mrb[3].mxu0 }
 0x2b7   :  { %v401_v41 = vpop.f32.mrb[4].mxu0  ;;  %v2182_v62 = vld [vmem:[#allocation2 + $0x10] sm:$0xff] }
 0x2b8   :  { %406 = vst.msk [vmem:[#allocation2 + $0x20] sm:$0xff] %vm22_vm1, %v401_v41  ;;  %v1775_v42 = vpop.f32.mrb[5].mxu0 }
 0x2bf   :  { %v1291_v18 = vld [vmem:[#allocation2 + $0x20] sm:$0xff] }
 0x322   :  { %v947_v43 = vpop.f32.mrb[10].mxu1 }
 0x323   :  { %952 = vrot.lane.b32.xlu0 %v947_v43, %s1990_s3  ;;  %v1836_v44 = vpop.f32.mrb[11].mxu1 }
 0x326   :  { %v557_v45 = vpop.f32.mrb[6].mxu0 }
 0x327   :  { %562 = vst.msk [vmem:[#allocation2 + $0x30] sm:$0xff] %vm22_vm1, %v557_v45  ;;  %v1797_v46 = vpop.f32.mrb[7].mxu0 }
 0x32a   :  { %v716_v48 = vpop.f32.mrb[8].mxu0 }
 0x32b   :  { %v720_v49 = vadd.f32 %v716_v48, %v645_v47  ;;  %v1815_v50 = vpop.f32.mrb[9].mxu0 }
 0x32d   :  { %v721_v51 = vmax.f32 %v720_v49, 0.0 }
 0x32e   :  { %v875_v52 = vld [vmem:[#allocation2 + $0x30] sm:$0xff] }
 0x32f   :  { %1828 = vmatmul.mubr.msk.f32.vlgmr.msra.gmra.mrb[10].mxu0 %vm646_vm2, %v721_v51 }
 0x330   :  { %1955 = vmatpush3.bf16.msra.mxu0 %v2146_v37  ;;  %1841 = vmatprep.mubr.msk.f32.mxu0 %vm1986_vm0, %v1987_v4 }
 0x331   :  { %1959 = vmatprep.subr.bf16.mxu0 %v1985_v2 }
 0x395   :  { %v953_v53 = vpop.permute.xlu0 %952 }
 0x396   :  { %v955_v54 = vadd.f32 %v953_v53, %v875_v52 }
 0x398   :  { %v956_v55 = vmax.f32 %v955_v54, 0.0 }
 0x39a   :  { %1035 = vrot.lane.b32.xlu1 %v956_v55, %s1992_s6 }
 0x402   :  { %v869_v57 = vpop.f32.mrb[10].mxu0 }
 0x403   :  { %v873_v58 = vadd.f32 %v869_v57, %v799_v56  ;;  %v1829_v59 = vpop.f32.mrb[11].mxu0 }
 0x405   :  { %v874_v60 = vmax.f32 %v873_v58, 0.0 }
 0x407   :  { %1842 = vmatmul.mubr.msk.f32.vlgmr.msra.gmra.mrb[12].mxu0 %vm646_vm2, %v874_v60 }
 0x408   :  { %1961 = vmatpush3.bf16.msra.mxu0 %v2146_v37  ;;  %1855 = vmatprep.mubr.msk.f32.mxu0 %vm1986_vm0, %v1987_v4 }
 0x409   :  { %1965 = vmatprep.subr.bf16.mxu0 %v1985_v2 }
 0x40c   :  { %v1036_v61 = vpop.permute.xlu1 %1035 }
 0x40d   :  { %1849 = vmatmul.mubr.msk.f32.vlgmr.msra.gmra.mrb[12].mxu1 %vm646_vm2, %v1036_v61 }
 0x40e   :  { %1964 = vmatpush3.bf16.msra.mxu1 %v2100_v16  ;;  %1862 = vmatprep.mubr.msk.f32.mxu1 %vm1986_vm0, %v1987_v4 }
 0x40f   :  { %1968 = vmatprep.subr.bf16.mxu1 %v1985_v2 }
 0x4da   :  { %v1027_v63 = vpop.f32.mrb[12].mxu0 }
 0x4db   :  { %v1031_v0 = vadd.f32 %v1027_v63, %v2182_v62  ;;  %v1843_v1 = vpop.f32.mrb[13].mxu0 }
 0x4dd   :  { %v1032_v3 = vmax.f32 %v1031_v0, 0.0 }
 0x4df   :  { %1115 = vst.msk [vmem:[%s2248_s4] sm:$0xff] %vm646_vm2, %v1032_v3  ;;  %1856 = vmatmul.mubr.msk.f32.vlgmr.msra.gmra.mrb[14].mxu0 %vm646_vm2, %v1032_v3 }
 0x4e0   :  { %v1105_v5 = vpop.f32.mrb[12].mxu1  ;;  %1967 = vmatpush3.bf16.msra.mxu0 %v2146_v37  ;;  %1869 = vmatprep.mubr.msk.f32.mxu0 %vm1986_vm0, %v1987_v4 }
 0x4e1   :  { %1110 = vrot.lane.b32.xlu0 %v1105_v5, %s1990_s3  ;;  %v1850_v6 = vpop.f32.mrb[13].mxu1  ;;  %1971 = vmatprep.subr.bf16.mxu0 %v1985_v2 }
 0x553   :  { %v1111_v8 = vpop.permute.xlu0 %1110 }
 0x554   :  { %v1113_v9 = vadd.f32 %v1111_v8, %v1033_v7 }
 0x556   :  { %v1114_v10 = vmax.f32 %v1113_v9, 0.0 }
 0x558   :  { %1199 = vrot.lane.b32.xlu1 %v1114_v10, %s1992_s6 }
 0x5b2   :  { %v1192_v12 = vpop.f32.mrb[14].mxu0 }
 0x5b3   :  { %v1196_v13 = vadd.f32 %v1192_v12, %v1122_v11  ;;  %v1857_v14 = vpop.f32.mrb[15].mxu0 }
 0x5b5   :  { %v1197_v15 = vmax.f32 %v1196_v13, 0.0 }
 0x5b7   :  { %1870 = vmatmul.mubr.msk.f32.vlgmr.msra.gmra.mrb[16].mxu0 %vm646_vm2, %v1197_v15 }
 0x5b8   :  { %1973 = vmatpush3.bf16.msra.mxu0 %v2146_v37  ;;  %1883 = vmatprep.mubr.msk.f32.mxu0 %vm1986_vm0, %v1987_v4 }
 0x5ca   :  { %v1200_v17 = vpop.permute.xlu1 %1199 }
 0x5cb   :  { %1863 = vmatmul.mubr.msk.f32.vlgmr.msra.gmra.mrb[14].mxu1 %vm646_vm2, %v1200_v17 }
 0x5cc   :  { %1970 = vmatpush3.bf16.msra.mxu1 %v2100_v16  ;;  %1876 = vmatprep.mubr.msk.f32.mxu1 %vm1986_vm0, %v1987_v4 }
 0x5cd   :  { %1974 = vmatprep.subr.bf16.mxu1 %v1985_v2 }
 0x68a   :  { %v1360_v19 = vpop.f32.mrb[16].mxu0 }
 0x68b   :  { %v1364_v20 = vadd.f32 %v1360_v19, %v1291_v18  ;;  %v1871_v21 = vpop.f32.mrb[17].mxu0 }
 0x68d   :  { %v1365_v22 = vmax.f32 %v1364_v20, 0.0 }
 0x68f   :  { %1884 = vmatmul.mubr.msk.f32.vlgmr.msra.gmra.mrb[18].mxu0 %vm646_vm2, %v1365_v22 }
 0x69e   :  { %v1269_v23 = vpop.f32.mrb[14].mxu1 }
 0x69f   :  { %1274 = vrot.lane.b32.xlu0 %v1269_v23, %s1990_s3  ;;  %v1864_v24 = vpop.f32.mrb[15].mxu1 }
 0x711   :  { %v1275_v25 = vpop.permute.xlu0 %1274 }
 0x712   :  { %v1277_v26 = vadd.f32 %v1291_v18, %v1275_v25 }
 0x714   :  { %v1278_v27 = vmax.f32 %v1277_v26, 0.0 }
 0x716   :  { %1367 = vrot.lane.b32.xlu1 %v1278_v27, %s1992_s6 }
 0x762   :  { %v1528_v28 = vpop.f32.mrb[18].mxu0 }
 0x763   :  { %v1885_v29 = vpop.f32.mrb[19].mxu0  ;;  %v1532_v32 = vadd.f32 %v1528_v28, %v1033_v7 }
 0x765   :  { %v1533_v33 = vmax.f32 %v1532_v32, 0.0 }
 0x788   :  { %v1368_v30 = vpop.permute.xlu1 %1367 }
 0x789   :  { %1877 = vmatmul.mubr.msk.f32.vlgmr.msra.gmra.mrb[16].mxu1 %vm646_vm2, %v1368_v30 }
 0x78a   :  { %1976 = vmatpush3.bf16.msra.mxu1 %v2100_v16  ;;  %1890 = vmatprep.mubr.msk.f32.mxu1 %vm1986_vm0, %v1987_v4 }
 0x85c   :  { %v1437_v2 = vpop.f32.mrb[16].mxu1 }
 0x85d   :  { %1442 = vrot.lane.b32.xlu0 %v1437_v2, %s1990_s3  ;;  %v1878_v31 = vpop.f32.mrb[17].mxu1 }
 0x861   :  { %1117 = vrot.lane.b32.xlu0 %v1114_v10, %s1988_s21 }
 0x865   :  { %1286 = vrot.lane.b32.xlu0 %v1278_v27, %s1991_s5 }
 0x869   :  { %1448 = vrot.lane.b32.xlu0 %v1365_v22, %s1991_s5 }
 0x86d   :  { %1616 = vrot.lane.b32.xlu0 %v1533_v33, %s1988_s21 }
 0x8cf   :  { %v1443_v34 = vpop.permute.xlu0 %1442 }
 0x8d0   :  { %v1445_v35 = vadd.f32 %v1443_v34, %v1122_v11 }
 0x8d2   :  { %v1446_v16 = vmax.f32 %v1445_v35, 0.0 }
 0x8d3   :  { %v1118_v36 = vpop.permute.xlu0 %1117 }
 0x8d4   :  { %1121 = vst.msk [vmem:[%s2248_s4] sm:$0xff] %vm1120_vm3, %v1118_v36  ;;  %1535 = vrot.lane.b32.xlu1 %v1446_v16, %s1992_s6 }
 0x8d7   :  { %v1287_v4 = vpop.permute.xlu0 %1286 }
 0x8d8   :  { %1280 = vrot.lane.b32.xlu1 %v1197_v15, %s1989_s27 }
 0x8db   :  { %v1449_v39 = vpop.permute.xlu0 %1448 }
 0x8df   :  { %v1617_v45 = vpop.permute.xlu0 %1616 }
 0x946   :  { %v1536_v37 = vpop.permute.xlu1 %1535 }
 0x947   :  { %1891 = vmatmul.mubr.msk.f32.vlgmr.msra.gmra.mrb[18].mxu1 %vm646_vm2, %v1536_v37 }
 0x94a   :  { %v1281_v38 = vpop.permute.xlu1 %1280 }
 0x94b   :  { %1284 = vst.msk [vmem:[%s2248_s4] sm:$0xff] %vm1283_vm4, %v1281_v38 }
 0x94c   :  { %1290 = vst.msk [vmem:[%s2248_s4] sm:$0xff] %vm1289_vm5, %v1287_v4 }
 0x94d   :  { %1452 = vst.msk [vmem:[%s2248_s4] sm:$0xff] %vm1451_vm6, %v1449_v39 }
 0xa1a   :  { %v1605_v40 = vpop.f32.mrb[18].mxu1 }
 0xa1b   :  { %v1892_v41 = vpop.f32.mrb[19].mxu1  ;;  %1610 = vrot.lane.b32.xlu1 %v1605_v40, %s1990_s3 }
 0xa1f   :  { %1454 = vrot.lane.b32.xlu1 %v1446_v16, %s1989_s27 }
 0xa8d   :  { %v1611_v42 = vpop.permute.xlu1 %1610 }
 0xa8e   :  { %v1613_v43 = vadd.f32 %v1611_v42, %v2182_v62 }
 0xa90   :  { %v1614_v46 = vmax.f32 %v1613_v43, 0.0 }
 0xa91   :  { %v1455_v44 = vpop.permute.xlu1 %1454 }
 0xa92   :  { %1458 = vst.msk [vmem:[%s2248_s4] sm:$0xff] %vm1457_vm7, %v1455_v44 }
 0xa93   :  { %1620 = vst.msk [vmem:[%s2248_s4] sm:$0xff] %vm1619_vm8, %v1617_v45 }
 0xa94   :  { %1622 = vst.msk [vmem:[%s2248_s4] sm:$0xff] %vm1621_vm9, %v1614_v46 }

</bundles_post_ra>
